<compile_context>
chip_gen: v6e
topology: v6e:2x2x1
jax: 0.10.0
libtpu: 0.0.40
codegen_flags: <defaults>
</compile_context>

<pallas_src>
import functools

import jax
import jax.numpy as jnp
from jax.experimental import pallas as pl
from jax.experimental.pallas import tpu as pltpu

ENC_IN_DIM = 16          # encoder_input_dim  -> flattened features = 256
ENC_OUT_DIM = 8          # encoder_output_dim
DROPOUT = 0.1            # eval mode -> no-op
BN_EPS = 1e-5

# Linear layer chain: encoder (5 linears) then decoder (5 linears).
_DIMS = [ENC_IN_DIM ** 2, 128, 64, 36, 18, ENC_OUT_DIM,
         18, 36, 64, 128, ENC_IN_DIM ** 2]
_N_LAYERS = len(_DIMS) - 1                 # 10 linear layers
_RELU_LAYERS = (0, 1, 2, 3, 5, 6, 7, 8)    # Linear + BN + ReLU (+Dropout) blocks
_ENC_LAYER = 4                             # output of this linear = encoded

_MAX_TB = 2048                   # batch-tile cap; ~16 MiB VMEM at this size
_BATCH_ALIGN = 16                # bf16 sublane packing -> tiles multiple of 16
_VMEM_LIMIT = 32 * 1024 * 1024   # explicit budget (covers v5e 16 MiB default)


def _rup(d, m):
    return ((d + m - 1) // m) * m


def _ae_kernel(x_ref, wslab_ref, wlast_ref, b_ref, enc_ref, dec_ref,
               *, dims_p, n_layers, relu_layers, enc_layer):
    """One batch tile: 10 bf16 MXU matmuls (f32 accum) + fused ReLU + softmax."""
    h = x_ref[...]                                     # (TB, 256) bf16
    row = 0
    for i in range(n_layers):
        d_in, d_out = dims_p[i], dims_p[i + 1]
        if i < n_layers - 1:
            w = wslab_ref[row:row + d_in, :]           # (d_in, 128) bf16
            row += d_in
        else:
            w = wlast_ref[...]                         # (128, 256) bf16
        b = b_ref[i:i + 1, :d_out]                     # (1, d_out) f32 (BN folded)
        h_lin = jnp.dot(h, w, preferred_element_type=jnp.float32) + b
        if i in relu_layers:
            # Fused ReLU + downcast: inter-layer activations stay bf16, so the
            # next layer's MXU operand needs no separate cast pass.
            h = jnp.maximum(h_lin, 0.0).astype(jnp.bfloat16)
        elif i == enc_layer:
            h = h_lin.astype(jnp.bfloat16)
            enc_ref[...] = h                           # bf16 encoded output
        else:                                          # last linear: keep f32
            h = h_lin
    # softmax over feature dim; last dim (256) is unpadded -> no column mask.
    m = jnp.max(h, axis=-1, keepdims=True)
    e = jnp.exp(h - m)
    denom = jnp.sum(e, axis=-1, keepdims=True)
    # exact reciprocal (EUP slot, still cheap) so decoded rows stay normalized.
    dec_ref[...] = (e * pl.reciprocal(denom, approx=False)).astype(dec_ref.dtype)


def init_params(key):
    """Deterministic PyTorch-default-style init (U(-1/sqrt(fan_in), +...))."""
    params = []
    for i in range(_N_LAYERS):
        fan_in, fan_out = _DIMS[i], _DIMS[i + 1]
        key, kw, kb = jax.random.split(key, 3)
        bound = 1.0 / (fan_in ** 0.5)
        w = jax.random.uniform(kw, (fan_in, fan_out), jnp.float32, -bound, bound)
        b = jax.random.uniform(kb, (fan_out,), jnp.float32, -bound, bound)
        if i in _RELU_LAYERS:  # these linears are followed by BatchNorm1d
            gamma = jnp.ones((fan_out,), jnp.float32)
            beta = jnp.zeros((fan_out,), jnp.float32)
            rmean = jnp.zeros((fan_out,), jnp.float32)
            rvar = jnp.ones((fan_out,), jnp.float32)
            s = gamma / jnp.sqrt(rvar + BN_EPS)
            t = beta - rmean * s
        else:                  # no BN after this linear
            s = jnp.ones((fan_out,), jnp.float32)
            t = jnp.zeros((fan_out,), jnp.float32)
        params.append((w, b, s, t))
    return params


def _pack_params(params, dims_p):
    """Fold BN into Linear (exact in eval mode) and pack into slabs.

    Returns:
      w_slab : (sum(dims_p[:9]), 128) bf16 -- weights of layers 0..8
      w_last : (128, 256)              bf16 -- weight of layer 9
      b_slab : (10, 256)               f32  -- folded biases, one row per layer
    Padded rows/cols stay zero -> padded activation columns stay zero through
    the chain (required invariant; do not change without rechecking).
    """
    slab_rows = sum(dims_p[:_N_LAYERS - 1])
    w_slab = jnp.zeros((slab_rows, 128), jnp.float32)
    b_slab = jnp.zeros((_N_LAYERS, dims_p[-1]), jnp.float32)
    w_last = None
    row = 0
    for i, (w, b, s, t) in enumerate(params):
        w_f = w * s[None, :]          # fold BN scale into output columns
        b_f = b * s + t               # fold BN shift into bias
        if i < _N_LAYERS - 1:
            w_slab = w_slab.at[row:row + w.shape[0], :w.shape[1]].set(w_f)
            row += dims_p[i]
        else:
            w_last = jnp.zeros((dims_p[i], dims_p[i + 1]), jnp.float32)
            w_last = w_last.at[:w.shape[0], :w.shape[1]].set(w_f)
        b_slab = b_slab.at[i, :b.shape[0]].set(b_f)
    return w_slab.astype(jnp.bfloat16), w_last.astype(jnp.bfloat16), b_slab


def autoencoder_forward(x, params):
    batch = x.shape[0]
    dims_p = [_rup(d, 128) for d in _DIMS]

    # --- batch tiling -------------------------------------------------------
    b_pad = _rup(batch, _BATCH_ALIGN)
    n_steps = max(1, pl.cdiv(b_pad, _MAX_TB))
    if n_steps == 1 and b_pad > _BATCH_ALIGN:
        n_steps = 2                      # v7x: give the second TensorCore work
    tb = _rup(pl.cdiv(b_pad, n_steps), _BATCH_ALIGN)
    b_pad = _rup(b_pad, tb)
    grid = (b_pad // tb,)

    # bf16 input: halves the largest per-row HBM read; no in-kernel cast.
    x_p = jnp.pad(x.astype(jnp.float32),
                  ((0, b_pad - batch), (0, dims_p[0] - _DIMS[0])))
    x_p = x_p.astype(jnp.bfloat16)

    w_slab, w_last, b_slab = _pack_params(params, dims_p)

    kernel = functools.partial(
        _ae_kernel,
        dims_p=tuple(dims_p), n_layers=_N_LAYERS,
        relu_layers=_RELU_LAYERS, enc_layer=_ENC_LAYER)

    enc_shape = (b_pad, dims_p[_ENC_LAYER + 1])
    dec_shape = (b_pad, dims_p[-1])

    flops = 2 * b_pad * sum(dims_p[i] * dims_p[i + 1] for i in range(_N_LAYERS))
    bytes_accessed = (x_p.size * 2 + w_slab.size * 2 + w_last.size * 2
                      + b_slab.size * 4
                      + enc_shape[0] * enc_shape[1] * 2
                      + dec_shape[0] * dec_shape[1] * 2)
    cost = pl.CostEstimate(flops=flops,
                           transcendentals=b_pad * dims_p[-1],
                           bytes_accessed=bytes_accessed)

    enc_p, dec_p = pl.pallas_call(
        kernel,
        grid=grid,
        out_shape=(
            jax.ShapeDtypeStruct(enc_shape, jnp.bfloat16),
            jax.ShapeDtypeStruct(dec_shape, jnp.bfloat16),
        ),
        in_specs=[
            pl.BlockSpec((tb, dims_p[0]), lambda i: (i, 0)),     # x: batch-tiled
            pl.BlockSpec(w_slab.shape, lambda i: (0, 0)),        # params resident
            pl.BlockSpec(w_last.shape, lambda i: (0, 0)),
            pl.BlockSpec(b_slab.shape, lambda i: (0, 0)),
        ],
        out_specs=(
            pl.BlockSpec((tb, enc_shape[1]), lambda i: (i, 0)),
            pl.BlockSpec((tb, dec_shape[1]), lambda i: (i, 0)),
        ),
        compiler_params=pltpu.CompilerParams(
            dimension_semantics=("parallel",),
            vmem_limit_bytes=_VMEM_LIMIT),
        cost_estimate=cost,
    )(x_p, w_slab, w_last, b_slab)

    # Cast back to f32 only for API parity with the torch module; drop these
    # casts if the downstream consumer accepts bf16.
    encoded = enc_p[:batch, :ENC_OUT_DIM].astype(jnp.float32)
    decoded = dec_p[:batch, :_DIMS[-1]].astype(jnp.float32)
    return encoded, decoded


def _reference_forward(x, params):
    """Plain-JAX f32 reference (eval-mode semantics), for correctness check."""
    h = x.astype(jnp.float32)
    enc = None
    for i, (w, b, s, t) in enumerate(params):
        h = h @ w + b
        h = h * s + t
        if i in _RELU_LAYERS:
            h = jnp.maximum(h, 0.0)
        if i == _ENC_LAYER:
            enc = h
    dec = jax.nn.softmax(h, axis=-1)
    return enc, dec


if __name__ == "__main__":
    key = jax.random.PRNGKey(0)
    key, kx = jax.random.split(key)

    batch = 8
    x = jax.random.normal(kx, (batch, ENC_IN_DIM ** 2), jnp.float32)

    params = init_params(key)

    encoded, decoded = autoencoder_forward(x, params)
    jax.block_until_ready((encoded, decoded))

    enc_ref, dec_ref = _reference_forward(x, params)
    assert encoded.shape == (batch, ENC_OUT_DIM)
    assert decoded.shape == (batch, ENC_IN_DIM ** 2)
    # bf16 weights + bf16 inter-layer activations + bf16 outputs -> looser
    # tolerance vs the f32 reference (intentional inference-time quantization).
    assert jnp.allclose(encoded, enc_ref, atol=5e-2, rtol=5e-2), \
        float(jnp.max(jnp.abs(encoded - enc_ref)))
    assert jnp.allclose(decoded, dec_ref, atol=3e-3, rtol=1e-1), \
        float(jnp.max(jnp.abs(decoded - dec_ref)))

    print("KERNEL_OK")
</pallas_src>

<mosaic_0001>
module attributes {stable_mosaic.version = 11 : i64} {
  func.func @_ae_kernel(%arg0: i32, %arg1: memref<16x256xbf16, #tpu.memory_space<vmem>>, %arg2: memref<1280x128xbf16, #tpu.memory_space<vmem>>, %arg3: memref<128x256xbf16, #tpu.memory_space<vmem>>, %arg4: memref<10x256xf32, #tpu.memory_space<vmem>>, %arg5: memref<16x128xbf16, #tpu.memory_space<vmem>>, %arg6: memref<16x256xbf16, #tpu.memory_space<vmem>>) attributes {dimension_semantics = [#tpu.dimension_semantics<parallel>], iteration_bounds = array<i64: 1>, scalar_prefetch = 0 : i64, scratch_operands = 0 : i64, tpu.core_type = #tpu.core_type<tc>, window_params = [{transform_indices = @transform_0, window_bounds = array<i64: 16, 256>}, {pipeline_mode = #tpu.pipeline_mode<synchronous>, transform_indices = @transform_1, window_bounds = array<i64: 1280, 128>}, {pipeline_mode = #tpu.pipeline_mode<synchronous>, transform_indices = @transform_2, window_bounds = array<i64: 128, 256>}, {pipeline_mode = #tpu.pipeline_mode<synchronous>, transform_indices = @transform_3, window_bounds = array<i64: 10, 256>}, {transform_indices = @transform_4, window_bounds = array<i64: 16, 128>}, {transform_indices = @transform_5, window_bounds = array<i64: 16, 256>}]} {
    %c0 = arith.constant 0 : index
    %c0_0 = arith.constant 0 : index
    %0 = vector.load %arg1[%c0, %c0_0] : memref<16x256xbf16, #tpu.memory_space<vmem>>, vector<16x256xbf16>
    %c0_1 = arith.constant 0 : index
    %c0_2 = arith.constant 0 : index
    %1 = vector.load %arg2[%c0_1, %c0_2] : memref<1280x128xbf16, #tpu.memory_space<vmem>>, vector<256x128xbf16>
    %c0_3 = arith.constant 0 : index
    %c0_4 = arith.constant 0 : index
    %2 = vector.load %arg4[%c0_3, %c0_4] : memref<10x256xf32, #tpu.memory_space<vmem>>, vector<1x128xf32>
    %cst = arith.constant dense<0.000000e+00> : vector<16x128xf32>
    %3 = tpu.matmul %0, %1, %cst {dimension_numbers = #tpu.dot_dimension_numbers<[1], [0], [0], [1], [0, 0, 1, 1], [], []>} : vector<16x256xbf16>, vector<256x128xbf16>, vector<16x128xf32> -> vector<16x128xf32>
    %4 = vector.broadcast %2 : vector<1x128xf32> to vector<16x128xf32>
    %5 = arith.addf %3, %4 : vector<16x128xf32>
    %cst_5 = arith.constant 0.000000e+00 : f32
    %6 = vector.broadcast %cst_5 : f32 to vector<16x128xf32>
    %7 = arith.maximumf %5, %6 : vector<16x128xf32>
    %8 = arith.truncf %7 : vector<16x128xf32> to vector<16x128xbf16>
    %c256 = arith.constant 256 : index
    %c0_6 = arith.constant 0 : index
    %9 = vector.load %arg2[%c256, %c0_6] : memref<1280x128xbf16, #tpu.memory_space<vmem>>, vector<128x128xbf16>
    %c1 = arith.constant 1 : index
    %c0_7 = arith.constant 0 : index
    %10 = vector.load %arg4[%c1, %c0_7] : memref<10x256xf32, #tpu.memory_space<vmem>>, vector<1x128xf32>
    %cst_8 = arith.constant dense<0.000000e+00> : vector<16x128xf32>
    %11 = tpu.matmul %8, %9, %cst_8 {dimension_numbers = #tpu.dot_dimension_numbers<[1], [0], [0], [1], [0, 0, 1, 1], [], []>} : vector<16x128xbf16>, vector<128x128xbf16>, vector<16x128xf32> -> vector<16x128xf32>
    %12 = vector.broadcast %10 : vector<1x128xf32> to vector<16x128xf32>
    %13 = arith.addf %11, %12 : vector<16x128xf32>
    %cst_9 = arith.constant 0.000000e+00 : f32
    %14 = vector.broadcast %cst_9 : f32 to vector<16x128xf32>
    %15 = arith.maximumf %13, %14 : vector<16x128xf32>
    %16 = arith.truncf %15 : vector<16x128xf32> to vector<16x128xbf16>
    %c384 = arith.constant 384 : index
    %c0_10 = arith.constant 0 : index
    %17 = vector.load %arg2[%c384, %c0_10] : memref<1280x128xbf16, #tpu.memory_space<vmem>>, vector<128x128xbf16>
    %c2 = arith.constant 2 : index
    %c0_11 = arith.constant 0 : index
    %18 = vector.load %arg4[%c2, %c0_11] : memref<10x256xf32, #tpu.memory_space<vmem>>, vector<1x128xf32>
    %cst_12 = arith.constant dense<0.000000e+00> : vector<16x128xf32>
    %19 = tpu.matmul %16, %17, %cst_12 {dimension_numbers = #tpu.dot_dimension_numbers<[1], [0], [0], [1], [0, 0, 1, 1], [], []>} : vector<16x128xbf16>, vector<128x128xbf16>, vector<16x128xf32> -> vector<16x128xf32>
    %20 = vector.broadcast %18 : vector<1x128xf32> to vector<16x128xf32>
    %21 = arith.addf %19, %20 : vector<16x128xf32>
    %cst_13 = arith.constant 0.000000e+00 : f32
    %22 = vector.broadcast %cst_13 : f32 to vector<16x128xf32>
    %23 = arith.maximumf %21, %22 : vector<16x128xf32>
    %24 = arith.truncf %23 : vector<16x128xf32> to vector<16x128xbf16>
    %c512 = arith.constant 512 : index
    %c0_14 = arith.constant 0 : index
    %25 = vector.load %arg2[%c512, %c0_14] : memref<1280x128xbf16, #tpu.memory_space<vmem>>, vector<128x128xbf16>
    %c3 = arith.constant 3 : index
    %c0_15 = arith.constant 0 : index
    %26 = vector.load %arg4[%c3, %c0_15] : memref<10x256xf32, #tpu.memory_space<vmem>>, vector<1x128xf32>
    %cst_16 = arith.constant dense<0.000000e+00> : vector<16x128xf32>
    %27 = tpu.matmul %24, %25, %cst_16 {dimension_numbers = #tpu.dot_dimension_numbers<[1], [0], [0], [1], [0, 0, 1, 1], [], []>} : vector<16x128xbf16>, vector<128x128xbf16>, vector<16x128xf32> -> vector<16x128xf32>
    %28 = vector.broadcast %26 : vector<1x128xf32> to vector<16x128xf32>
    %29 = arith.addf %27, %28 : vector<16x128xf32>
    %cst_17 = arith.constant 0.000000e+00 : f32
    %30 = vector.broadcast %cst_17 : f32 to vector<16x128xf32>
    %31 = arith.maximumf %29, %30 : vector<16x128xf32>
    %32 = arith.truncf %31 : vector<16x128xf32> to vector<16x128xbf16>
    %c640 = arith.constant 640 : index
    %c0_18 = arith.constant 0 : index
    %33 = vector.load %arg2[%c640, %c0_18] : memref<1280x128xbf16, #tpu.memory_space<vmem>>, vector<128x128xbf16>
    %c4 = arith.constant 4 : index
    %c0_19 = arith.constant 0 : index
    %34 = vector.load %arg4[%c4, %c0_19] : memref<10x256xf32, #tpu.memory_space<vmem>>, vector<1x128xf32>
    %cst_20 = arith.constant dense<0.000000e+00> : vector<16x128xf32>
    %35 = tpu.matmul %32, %33, %cst_20 {dimension_numbers = #tpu.dot_dimension_numbers<[1], [0], [0], [1], [0, 0, 1, 1], [], []>} : vector<16x128xbf16>, vector<128x128xbf16>, vector<16x128xf32> -> vector<16x128xf32>
    %36 = vector.broadcast %34 : vector<1x128xf32> to vector<16x128xf32>
    %37 = arith.addf %35, %36 : vector<16x128xf32>
    %38 = arith.truncf %37 : vector<16x128xf32> to vector<16x128xbf16>
    %c0_21 = arith.constant 0 : index
    %c0_22 = arith.constant 0 : index
    %39 = vector.load %arg5[%c0_21, %c0_22] : memref<16x128xbf16, #tpu.memory_space<vmem>>, vector<16x128xbf16>
    tpu.vector_store %arg5[%c0_21, %c0_22], %38 {strides = array<i32>} : memref<16x128xbf16, #tpu.memory_space<vmem>>, vector<16x128xbf16>,
    %c768 = arith.constant 768 : index
    %c0_23 = arith.constant 0 : index
    %40 = vector.load %arg2[%c768, %c0_23] : memref<1280x128xbf16, #tpu.memory_space<vmem>>, vector<128x128xbf16>
    %c5 = arith.constant 5 : index
    %c0_24 = arith.constant 0 : index
    %41 = vector.load %arg4[%c5, %c0_24] : memref<10x256xf32, #tpu.memory_space<vmem>>, vector<1x128xf32>
    %cst_25 = arith.constant dense<0.000000e+00> : vector<16x128xf32>
    %42 = tpu.matmul %38, %40, %cst_25 {dimension_numbers = #tpu.dot_dimension_numbers<[1], [0], [0], [1], [0, 0, 1, 1], [], []>} : vector<16x128xbf16>, vector<128x128xbf16>, vector<16x128xf32> -> vector<16x128xf32>
    %43 = vector.broadcast %41 : vector<1x128xf32> to vector<16x128xf32>
    %44 = arith.addf %42, %43 : vector<16x128xf32>
    %cst_26 = arith.constant 0.000000e+00 : f32
    %45 = vector.broadcast %cst_26 : f32 to vector<16x128xf32>
    %46 = arith.maximumf %44, %45 : vector<16x128xf32>
    %47 = arith.truncf %46 : vector<16x128xf32> to vector<16x128xbf16>
    %c896 = arith.constant 896 : index
    %c0_27 = arith.constant 0 : index
    %48 = vector.load %arg2[%c896, %c0_27] : memref<1280x128xbf16, #tpu.memory_space<vmem>>, vector<128x128xbf16>
    %c6 = arith.constant 6 : index
    %c0_28 = arith.constant 0 : index
    %49 = vector.load %arg4[%c6, %c0_28] : memref<10x256xf32, #tpu.memory_space<vmem>>, vector<1x128xf32>
    %cst_29 = arith.constant dense<0.000000e+00> : vector<16x128xf32>
    %50 = tpu.matmul %47, %48, %cst_29 {dimension_numbers = #tpu.dot_dimension_numbers<[1], [0], [0], [1], [0, 0, 1, 1], [], []>} : vector<16x128xbf16>, vector<128x128xbf16>, vector<16x128xf32> -> vector<16x128xf32>
    %51 = vector.broadcast %49 : vector<1x128xf32> to vector<16x128xf32>
    %52 = arith.addf %50, %51 : vector<16x128xf32>
    %cst_30 = arith.constant 0.000000e+00 : f32
    %53 = vector.broadcast %cst_30 : f32 to vector<16x128xf32>
    %54 = arith.maximumf %52, %53 : vector<16x128xf32>
    %55 = arith.truncf %54 : vector<16x128xf32> to vector<16x128xbf16>
    %c1024 = arith.constant 1024 : index
    %c0_31 = arith.constant 0 : index
    %56 = vector.load %arg2[%c1024, %c0_31] : memref<1280x128xbf16, #tpu.memory_space<vmem>>, vector<128x128xbf16>
    %c7 = arith.constant 7 : index
    %c0_32 = arith.constant 0 : index
    %57 = vector.load %arg4[%c7, %c0_32] : memref<10x256xf32, #tpu.memory_space<vmem>>, vector<1x128xf32>
    %cst_33 = arith.constant dense<0.000000e+00> : vector<16x128xf32>
    %58 = tpu.matmul %55, %56, %cst_33 {dimension_numbers = #tpu.dot_dimension_numbers<[1], [0], [0], [1], [0, 0, 1, 1], [], []>} : vector<16x128xbf16>, vector<128x128xbf16>, vector<16x128xf32> -> vector<16x128xf32>
    %59 = vector.broadcast %57 : vector<1x128xf32> to vector<16x128xf32>
    %60 = arith.addf %58, %59 : vector<16x128xf32>
    %cst_34 = arith.constant 0.000000e+00 : f32
    %61 = vector.broadcast %cst_34 : f32 to vector<16x128xf32>
    %62 = arith.maximumf %60, %61 : vector<16x128xf32>
    %63 = arith.truncf %62 : vector<16x128xf32> to vector<16x128xbf16>
    %c1152 = arith.constant 1152 : index
    %c0_35 = arith.constant 0 : index
    %64 = vector.load %arg2[%c1152, %c0_35] : memref<1280x128xbf16, #tpu.memory_space<vmem>>, vector<128x128xbf16>
    %c8 = arith.constant 8 : index
    %c0_36 = arith.constant 0 : index
    %65 = vector.load %arg4[%c8, %c0_36] : memref<10x256xf32, #tpu.memory_space<vmem>>, vector<1x128xf32>
    %cst_37 = arith.constant dense<0.000000e+00> : vector<16x128xf32>
    %66 = tpu.matmul %63, %64, %cst_37 {dimension_numbers = #tpu.dot_dimension_numbers<[1], [0], [0], [1], [0, 0, 1, 1], [], []>} : vector<16x128xbf16>, vector<128x128xbf16>, vector<16x128xf32> -> vector<16x128xf32>
    %67 = vector.broadcast %65 : vector<1x128xf32> to vector<16x128xf32>
    %68 = arith.addf %66, %67 : vector<16x128xf32>
    %cst_38 = arith.constant 0.000000e+00 : f32
    %69 = vector.broadcast %cst_38 : f32 to vector<16x128xf32>
    %70 = arith.maximumf %68, %69 : vector<16x128xf32>
    %71 = arith.truncf %70 : vector<16x128xf32> to vector<16x128xbf16>
    %c0_39 = arith.constant 0 : index
    %c0_40 = arith.constant 0 : index
    %72 = vector.load %arg3[%c0_39, %c0_40] : memref<128x256xbf16, #tpu.memory_space<vmem>>, vector<128x256xbf16>
    %c9 = arith.constant 9 : index
    %c0_41 = arith.constant 0 : index
    %73 = vector.load %arg4[%c9, %c0_41] : memref<10x256xf32, #tpu.memory_space<vmem>>, vector<1x256xf32>
    %cst_42 = arith.constant dense<0.000000e+00> : vector<16x256xf32>
    %74 = tpu.matmul %71, %72, %cst_42 {dimension_numbers = #tpu.dot_dimension_numbers<[1], [0], [0], [1], [0, 0, 1, 1], [], []>} : vector<16x128xbf16>, vector<128x256xbf16>, vector<16x256xf32> -> vector<16x256xf32>
    %75 = vector.broadcast %73 : vector<1x256xf32> to vector<16x256xf32>
    %76 = arith.addf %74, %75 : vector<16x256xf32>
    %cst_43 = arith.constant dense<0xFF800000> : vector<16xf32>
    %77 = vector.multi_reduction <maximumf>, %76, %cst_43 [1] : vector<16x256xf32> to vector<16xf32>
    %78 = vector.shape_cast %77 : vector<16xf32> to vector<16x1xf32>
    %79 = vector.broadcast %78 : vector<16x1xf32> to vector<16x256xf32>
    %80 = arith.subf %76, %79 : vector<16x256xf32>
    %81 = math.exp %80 : vector<16x256xf32>
    %cst_44 = arith.constant dense<0.000000e+00> : vector<16xf32>
    %82 = vector.multi_reduction <add>, %81, %cst_44 [1] : vector<16x256xf32> to vector<16xf32>
    %83 = vector.shape_cast %82 : vector<16xf32> to vector<16x1xf32>
    %84 = tpu.reciprocal %83 : vector<16x1xf32> -> vector<16x1xf32>
    %85 = vector.broadcast %84 : vector<16x1xf32> to vector<16x256xf32>
    %86 = arith.mulf %81, %85 : vector<16x256xf32>
    %87 = arith.truncf %86 : vector<16x256xf32> to vector<16x256xbf16>
    %c0_45 = arith.constant 0 : index
    %c0_46 = arith.constant 0 : index
    %88 = vector.load %arg6[%c0_45, %c0_46] : memref<16x256xbf16, #tpu.memory_space<vmem>>, vector<16x256xbf16>
    tpu.vector_store %arg6[%c0_45, %c0_46], %87 {strides = array<i32>} : memref<16x256xbf16, #tpu.memory_space<vmem>>, vector<16x256xbf16>,
    return
  }
  func.func @transform_0(%arg0: i32) -> (i32, i32) {
    %c0_i32 = arith.constant 0 : i32
    %c0_i32_0 = arith.constant 0 : i32
    return %arg0, %c0_i32 : i32, i32
  }
  func.func @transform_1(%arg0: i32) -> (i32, i32) {
    %c0_i32 = arith.constant 0 : i32
    %c0_i32_0 = arith.constant 0 : i32
    %c0_i32_1 = arith.constant 0 : i32
    return %c0_i32, %c0_i32_0 : i32, i32
  }
  func.func @transform_2(%arg0: i32) -> (i32, i32) {
    %c0_i32 = arith.constant 0 : i32
    %c0_i32_0 = arith.constant 0 : i32
    %c0_i32_1 = arith.constant 0 : i32
    return %c0_i32, %c0_i32_0 : i32, i32
  }
  func.func @transform_3(%arg0: i32) -> (i32, i32) {
    %c0_i32 = arith.constant 0 : i32
    %c0_i32_0 = arith.constant 0 : i32
    %c0_i32_1 = arith.constant 0 : i32
    return %c0_i32, %c0_i32_0 : i32, i32
  }
  func.func @transform_4(%arg0: i32) -> (i32, i32) {
    %c0_i32 = arith.constant 0 : i32
    %c0_i32_0 = arith.constant 0 : i32
    return %arg0, %c0_i32 : i32, i32
  }
  func.func @transform_5(%arg0: i32) -> (i32, i32) {
    %c0_i32 = arith.constant 0 : i32
    %c0_i32_0 = arith.constant 0 : i32
    return %arg0, %c0_i32 : i32, i32
  }
}

</mosaic_0001>

<bundles_post_ra>
// kernel: tpu_custom_call.1
= control target key start
LH: loop header
LB: loop body
LE: loop exit
PB: predicated region body
PF: predicated region fallthrough
CT: control target
= control target key end

     0   :  { %11 = vsyncpa [#allocation3], 0  ;;  %s2159_s0 = inlined_call_operand.hbm [shape: bf16[16,256], index: 0, kind: input, shape index: {}]   ;;  %s2160_s1 = inlined_call_operand.hbm [shape: bf16[1280,128], index: 1, kind: input, shape index: {}]   ;;  %s2161_s2 = inlined_call_operand.hbm [shape: bf16[128,256], index: 2, kind: input, shape index: {}]   ;;  %s2162_s3 = inlined_call_operand.hbm [shape: f32[10,256], index: 3, kind: input, shape index: {}]   ;;  %s2163_s4 = inlined_call_operand.hbm [shape: bf16[16,128], index: 4, kind: output, shape index: {0}]   ;;  %s2164_s5 = inlined_call_operand.hbm [shape: bf16[16,256], index: 5, kind: output, shape index: {1}]  }
   0x1   :  { %12 = vsyncpa [#allocation6], 0 }
   0x2   :  { %13 = vsyncpa [#allocation9], 0 }
   0x3   :  { %14 = vsyncpa [#allocation4], 0 }
   0x4   :  { %15 = vsyncpa [#allocation12], 0  ;;  %s2001_s18 = smov [#allocation5]  }
   0x5   :  { %s33_s19 = sshll.u32 %s2001_s18, 4  ;;  %s34_s19 = int_to_ptr.vmem [resolvable:$true] %s33_s19 }
   0x6   :  { %s1879_s20 = scalar_lea.vmem %s34_s19, 10240  ;;  %p1884_p1 = scmp.lt.s32.totalorder %s34_s19, %s34_s19 }
   0x7   :  { %p1880_p0 = scmp.ne.s32.totalorder %s34_s19, %s1879_s20  ;;  %p1885_p2 = scmp.lt.s32.totalorder %s1879_s20, %s1879_s20 }
   0x9   :  { %p1886_p3 = por %p1885_p2, %p1884_p1 }
   0xb   :  { %p1887_p4 = pnand %p1886_p3, %p1880_p0 }
   0xd   :  { %1890 = shalt.err (!%p1887_p4)
}
   0xe   :  { %s2002_s21 = smov 64   ;;  %s2003_s22 = smov 4  }
   0xf   :  { %39 = dma.hbm_to_vmem [thread:$0]  %s2160_s1, 10240, %s34_s19, [#allocation6], %s2002_s21, %s2002_s21, %s2003_s22  }
  0x10   :  { %s2004_s25 = smov [#allocation2]  }
  0x11   :  { %s21_s26 = sshll.u32 %s2004_s25, 4  ;;  %s22_s26 = int_to_ptr.vmem [resolvable:$true] %s21_s26 }
  0x12   :  { %s1899_s27 = scalar_lea.vmem %s22_s26, 256  ;;  %p1904_p6 = scmp.lt.s32.totalorder %s22_s26, %s22_s26 }
  0x13   :  { %p1900_p5 = scmp.ne.s32.totalorder %s22_s26, %s1899_s27  ;;  %p1905_p7 = scmp.lt.s32.totalorder %s1899_s27, %s1899_s27 }
  0x15   :  { %p1906_p8 = por %p1905_p7, %p1904_p6 }
  0x17   :  { %p1907_p9 = pnand %p1906_p8, %p1900_p5 }
  0x19   :  { %1910 = shalt.err (!%p1907_p9)
}
  0x1a   :  { %s2005_s28 = smov 128   ;;  %s2006_s29 = smov 8  }
  0x1b   :  { %27 = dma.hbm_to_vmem [thread:$0]  %s2159_s0, 256, %s22_s26, [#allocation3], %s2005_s28, %s2005_s28, %s2006_s29  }
  0x1c   :  { %s2007_s1 = smov [#allocation7]   ;;  %s2008_s8 = smov [#allocation8]  }
  0x1d   :  { %s45_s7 = sshll.u32 %s2007_s1, 4  ;;  %s57_s9 = sshll.u32 %s2008_s8, 4  ;;  %s46_s7 = int_to_ptr.vmem [resolvable:$true] %s45_s7  ;;  %s58_s9 = int_to_ptr.vmem [resolvable:$true] %s57_s9 }
  0x1e   :  { %s1919_s10 = scalar_lea.vmem %s46_s7, 2048  ;;  %p1924_p11 = scmp.lt.s32.totalorder %s46_s7, %s46_s7 }
  0x1f   :  { %p1920_p10 = scmp.ne.s32.totalorder %s46_s7, %s1919_s10  ;;  %p1925_p12 = scmp.lt.s32.totalorder %s1919_s10, %s1919_s10 }
  0x21   :  { %p1926_p13 = por %p1925_p12, %p1924_p11 }
  0x23   :  { %p1927_p0 = pnand %p1926_p13, %p1920_p10 }
  0x25   :  { %1930 = shalt.err (!%p1927_p0)
}
  0x26   :  { %51 = dma.hbm_to_vmem [thread:$0]  %s2161_s2, 2048, %s46_s7, [#allocation6], %s2005_s28, %s2005_s28, %s2006_s29  }
  0x27   :  { %s1939_s0 = scalar_lea.vmem %s58_s9, 512  ;;  %p1944_p2 = scmp.lt.s32.totalorder %s58_s9, %s58_s9 }
  0x28   :  { %p1940_p1 = scmp.ne.s32.totalorder %s58_s9, %s1939_s0  ;;  %p1945_p3 = scmp.lt.s32.totalorder %s1939_s0, %s1939_s0 }
  0x2a   :  { %p1946_p4 = por %p1945_p3, %p1944_p2 }
  0x2c   :  { %p1947_p5 = pnand %p1946_p4, %p1940_p1 }
  0x2e   :  { %1950 = shalt.err (!%p1947_p5)
}
  0x2f   :  { %s2009_s13 = smov 256   ;;  %s2010_s14 = smov 16  }
  0x30   :  { %63 = dma.hbm_to_vmem [thread:$0]  %s2162_s3, 512, %s58_s9, [#allocation9], %s2009_s13, %s2009_s13, %s2010_s14  }
  0x31   :  { %1991 = dma.done.wait [#allocation3], 256  }
  0x32   :  { %1992 = vsyncadd [#allocation3], 4294967040 }
  0x33   :  { %1993 = dma.done.wait [#allocation6], 12288  }
  0x34   :  { %1994 = vsyncadd [#allocation6], 4294955008 }
  0x35   :  { %1995 = dma.done.wait [#allocation9], 512  }
  0x36   :  { %1996 = vsyncadd [#allocation9], 4294966784  ;;  %v2011_v0 = vmov 0.0   ;;  %v1752_v1 = vld [vmem:[#allocation5 + $0x78] sm:$0xff]   ;;  %v1754_v3 = vld [vmem:[#allocation5 + $0x70] sm:$0xff]   ;;  %vm2012_vm0 = vmmov 0  }
  0x37   :  { %1577 = vmatprep.subr.bf16.mxu1 %v2011_v0  ;;  %v1753_v2 = vld [vmem:[#allocation5 + $0x38] sm:$0xff]   ;;  %1483 = vmatprep.subr.bf16.mxu0 %v1752_v1  ;;  %v1755_v4 = vld [vmem:[#allocation5 + $0x30] sm:$0xff]   ;;  %v1756_v5 = vld [vmem:[#allocation5 + $0x68] sm:$0xff]   ;;  %s2014_s2 = smov [#allocation10]  }
  0x38   :  { %1484 = vmatpush3.bf16.msra.mxu0 %v1753_v2  ;;  %v1757_v6 = vld [vmem:[#allocation5 + $0x28] sm:$0xff]   ;;  %v1758_v7 = vld [vmem:[#allocation5 + $0x60] sm:$0xff]   ;;  %v1760_v9 = vld [vmem:[#allocation5 + $0x58] sm:$0xff]   ;;  %1593 = vmatprep.mubr.msk.bf16.mxu1 %vm2012_vm0, %v2011_v0  ;;  %s1342_s3 = sshll.u32 %s2014_s2, 4  ;;  %s1343_s3 = int_to_ptr.vmem [resolvable:$true] %s1342_s3 }
  0x39   :  { %1485 = vmatprep.subr.bf16.mxu0 %v1754_v3  ;;  %v1759_v8 = vld [vmem:[#allocation5 + $0x20] sm:$0xff]   ;;  %v1761_v10 = vld [vmem:[#allocation5 + $0x18] sm:$0xff]   ;;  %v1762_v11 = vld [vmem:[#allocation5 + $0x50] sm:$0xff]   ;;  %s1951_s17 = scalar_lea.vmem %s1343_s3, 128  ;;  %p1956_p7 = scmp.lt.s32.totalorder %s1343_s3, %s1343_s3 }
  0x3a   :  { %v1763_v12 = vld [vmem:[#allocation5 + $0x10] sm:$0xff]   ;;  %v1771_v14 = vld [vmem:[#allocation5 + $0xb8] sm:$0xff]   ;;  %v1764_v15 = vld [vmem:[#allocation5 + $0x48] sm:$0xff]   ;;  %p1952_p6 = scmp.ne.s32.totalorder %s1343_s3, %s1951_s17  ;;  %p1957_p8 = scmp.lt.s32.totalorder %s1951_s17, %s1951_s17 }
  0x3b   :  { %v1770_v13 = vld [vmem:[#allocation2 + $0x4] ss:$8 sps:$4 sm:$0xff]   ;;  %1578 = vmatpush3.bf16.msra.mxu1 %v1771_v14  ;;  %v1765_v17 = vld [vmem:[#allocation5 + $0x8] sm:$0xff]   ;;  %v1766_v18 = vld [vmem:[#allocation5 + $0x40] sm:$0xff]  }
  0x3c   :  { %1486 = vmatpush3.bf16.msra.mxu0 %v1755_v4  ;;  %250 = vmatprep.mubr.bf16.mxu0 %v1770_v13  ;;  %v1772_v16 = vld [vmem:[#allocation5 + $0xb0] sm:$0xff]   ;;  %v1773_v19 = vld [vmem:[#allocation5 + $0xa8] sm:$0xff]   ;;  %v1767_v20 = vld [vmem:[#allocation5] sm:$0xff]   ;;  %p1958_p9 = por %p1957_p8, %p1956_p7 }
  0x3d   :  { %1487 = vmatprep.subr.bf16.mxu0 %v1756_v5  ;;  %1579 = vmatprep.subr.bf16.mxu1 %v2011_v0  ;;  %v1774_v21 = vld [vmem:[#allocation5 + $0xa0] sm:$0xff]   ;;  %v1768_v22 = vld [vmem:[#allocation2] ss:$8 sps:$4 sm:$0xff]   ;;  %v1777_v25 = vld [vmem:[#allocation5 + $0x88] sm:$0xff]  }
  0x3e   :  { %v1775_v23 = vld [vmem:[#allocation5 + $0x98] sm:$0xff]   ;;  %v1776_v24 = vld [vmem:[#allocation5 + $0x90] sm:$0xff]   ;;  %v1778_v26 = vld [vmem:[#allocation5 + $0x80] sm:$0xff]   ;;  %p1959_p10 = pnand %p1958_p9, %p1952_p6 }
  0x3f   :  { %1580 = vmatpush3.bf16.msra.mxu1 %v1772_v16  ;;  %v1779_v27 = vld [vmem:[#allocation5 + $0xf8] sm:$0xff]   ;;  %v1780_v28 = vld [vmem:[#allocation5 + $0xf0] sm:$0xff]   ;;  %v1781_v29 = vld [vmem:[#allocation5 + $0xe8] sm:$0xff]  }
  0x40   :  { %1488 = vmatpush3.bf16.msra.mxu0 %v1757_v6  ;;  %1581 = vmatprep.subr.bf16.mxu1 %v2011_v0  ;;  %v1782_v30 = vld [vmem:[#allocation5 + $0xe0] sm:$0xff]   ;;  %v1783_v31 = vld [vmem:[#allocation5 + $0xd8] sm:$0xff]   ;;  %v1784_v44 = vld [vmem:[#allocation5 + $0xd0] sm:$0xff]  }
  0x41   :  { %1489 = vmatprep.subr.bf16.mxu0 %v1758_v7  ;;  %v111_v35 = vld [vmem:[#allocation8] ss:$0 sm:$0xff]  ;;  %v1785_v45 = vld [vmem:[#allocation5 + $0xc8] sm:$0xff]   ;;  %v1787_v47 = vld [vmem:[#allocation5 + $0x138] sm:$0xff]  }
  0x42   :  { %v1786_v46 = vld [vmem:[#allocation5 + $0xc0] sm:$0xff]   ;;  %v1788_v48 = vld [vmem:[#allocation5 + $0x130] sm:$0xff]   ;;  %v1789_v49 = vld [vmem:[#allocation5 + $0x128] sm:$0xff]  }
  0x43   :  { %1582 = vmatpush3.bf16.msra.mxu1 %v1773_v19  ;;  %v1790_v50 = vld [vmem:[#allocation5 + $0x120] sm:$0xff]   ;;  %v1791_v51 = vld [vmem:[#allocation5 + $0x118] sm:$0xff]   ;;  %v1792_v62 = vld [vmem:[#allocation5 + $0x110] sm:$0xff]  }
  0x44   :  { %1490 = vmatpush3.bf16.msra.mxu0 %v1759_v8  ;;  %1583 = vmatprep.subr.bf16.mxu1 %v2011_v0  ;;  %v278_v52 = vld [vmem:[#allocation8 + $0x1] ss:$0 sm:$0xff]  ;;  %v1793_v63 = vld [vmem:[#allocation5 + $0x108] sm:$0xff]   ;;  %v1795_v2 = vld [vmem:[#allocation5 + $0x178] sm:$0xff]  }
  0x45   :  { %1491 = vmatprep.subr.bf16.mxu0 %v1760_v9  ;;  %v1794_v1 = vld [vmem:[#allocation5 + $0x100] sm:$0xff]   ;;  %v1796_v3 = vld [vmem:[#allocation5 + $0x170] sm:$0xff]   ;;  %v1797_v4 = vld [vmem:[#allocation5 + $0x168] sm:$0xff]  }
  0x46   :  { %v1798_v5 = vld [vmem:[#allocation5 + $0x160] sm:$0xff]   ;;  %v1799_v6 = vld [vmem:[#allocation5 + $0x158] sm:$0xff]  }
  0x47   :  { %1584 = vmatpush3.bf16.msra.mxu1 %v1774_v21  ;;  %v387_v7 = vld [vmem:[#allocation8 + $0x2] ss:$0 sm:$0xff]  ;;  %v1804_v21 = vld [vmem:[#allocation5 + $0x1b0] sm:$0xff]  }
  0x48   :  { %1492 = vmatpush3.bf16.msra.mxu0 %v1761_v10  ;;  %1585 = vmatprep.subr.bf16.mxu1 %v2011_v0  ;;  %v1802_v19 = vld [vmem:[#allocation5 + $0x140] sm:$0xff]  }
  0x49   :  { %1493 = vmatprep.subr.bf16.mxu0 %v1762_v11 }
  0x4b   :  { %1586 = vmatpush3.bf16.msra.mxu1 %v1775_v23  ;;  %v1806_v23 = vld [vmem:[#allocation5 + $0x1a0] sm:$0xff]  }
  0x4c   :  { %1494 = vmatpush3.bf16.msra.mxu0 %v1763_v12  ;;  %1587 = vmatprep.subr.bf16.mxu1 %v2011_v0 }
  0x4d   :  { %1495 = vmatprep.subr.bf16.mxu0 %v1764_v15 }
  0x4f   :  { %1588 = vmatpush3.bf16.msra.mxu1 %v1776_v24  ;;  %v1807_v24 = vld [vmem:[#allocation5 + $0x198] sm:$0xff]  }
  0x50   :  { %1496 = vmatpush3.bf16.msra.mxu0 %v1765_v17  ;;  %1589 = vmatprep.subr.bf16.mxu1 %v2011_v0  ;;  %v1800_v17 = vld [vmem:[#allocation5 + $0x150] sm:$0xff]  }
  0x51   :  { %1497 = vmatprep.subr.bf16.mxu0 %v1766_v18  ;;  %v1801_v18 = vld [vmem:[#allocation5 + $0x148] sm:$0xff]  }
  0x53   :  { %1590 = vmatpush3.bf16.msra.mxu1 %v1777_v25  ;;  %v1808_v25 = vld [vmem:[#allocation5 + $0x190] sm:$0xff]  }
  0x54   :  { %1498 = vmatpush3.bf16.msra.mxu0 %v1767_v20  ;;  %1591 = vmatprep.subr.bf16.mxu1 %v2011_v0  ;;  %v1803_v20 = vld [vmem:[#allocation5 + $0x1b8] sm:$0xff]  }
  0x55   :  { %1597 = vmatprep.subr.bf16.mxu0 %v2011_v0 }
  0x57   :  { %251 = vmatmul.mubr.bf16.vlgmr.msra.gmra.mxu0 %v1768_v22  ;;  %1592 = vmatpush3.bf16.msra.mxu1 %v1778_v26  ;;  %v1805_v22 = vld [vmem:[#allocation5 + $0x1a8] sm:$0xff]   ;;  %v496_v26 = vld [vmem:[#allocation8 + $0x3] ss:$0 sm:$0xff] }
  0x58   :  { %1613 = vmatprep.mubr.msk.bf16.mxu0 %vm2012_vm0, %v2011_v0  ;;  %1617 = vmatprep.subr.bf16.mxu1 %v2011_v0 }
  0x59   :  { %1598 = vmatpush3.bf16.msra.mxu0 %v1779_v27 }
  0x5a   :  { %1599 = vmatprep.subr.bf16.mxu0 %v2011_v0 }
  0x5d   :  { %1600 = vmatpush3.bf16.msra.mxu0 %v1780_v28 }
  0x5e   :  { %1601 = vmatprep.subr.bf16.mxu0 %v2011_v0 }
  0x61   :  { %1602 = vmatpush3.bf16.msra.mxu0 %v1781_v29 }
  0x62   :  { %1603 = vmatprep.subr.bf16.mxu0 %v2011_v0 }
  0x65   :  { %1604 = vmatpush3.bf16.msra.mxu0 %v1782_v30 }
  0x66   :  { %1605 = vmatprep.subr.bf16.mxu0 %v2011_v0 }
  0x69   :  { %1606 = vmatpush3.bf16.msra.mxu0 %v1783_v31 }
  0x6a   :  { %1607 = vmatprep.subr.bf16.mxu0 %v2011_v0 }
  0x6d   :  { %1608 = vmatpush3.bf16.msra.mxu0 %v1784_v44  ;;  %v605_v44 = vld [vmem:[#allocation8 + $0x4] ss:$0 sm:$0xff] }
  0x6e   :  { %1609 = vmatprep.subr.bf16.mxu0 %v2011_v0 }
  0x71   :  { %1610 = vmatpush3.bf16.msra.mxu0 %v1785_v45 }
  0x72   :  { %1611 = vmatprep.subr.bf16.mxu0 %v2011_v0 }
  0x75   :  { %1612 = vmatpush3.bf16.msra.mxu0 %v1786_v46 }
  0x76   :  { %1637 = vmatprep.subr.bf16.mxu0 %v2011_v0 }
 0x117   :  { %v1499_v32 = vpop.f32.mrf.mxu0 }
 0x119   :  { %v1500_v33 = vpop.f32.mrf.mxu0 }
 0x11a   :  { %v1501_v34 = vadd.f32 %v1500_v33, %v1499_v32 }
 0x11b   :  { %v1502_v36 = vpop.f32.mrf.mxu0 }
 0x11c   :  { %v253_v38 = vadd.f32 %v1501_v34, %v111_v35 }
 0x11d   :  { %v1503_v37 = vpop.f32.mrf.mxu0 }
 0x11e   :  { %v1504_v39 = vadd.f32 %v1503_v37, %v1502_v36  ;;  %v259_v41 = vmax.f32 %v253_v38, 0.0  ;;  %v1809_v36 = vld [vmem:[#allocation5 + $0x188] sm:$0xff]   ;;  %v1810_v37 = vld [vmem:[#allocation5 + $0x180] sm:$0xff]   ;;  %v1811_v38 = vld [vmem:[#allocation5 + $0x1f8] sm:$0xff]  }
 0x120   :  { %v256_v40 = vadd.f32 %v1504_v39, %v111_v35  ;;  %v1812_v39 = vld [vmem:[#allocation5 + $0x1f0] sm:$0xff]  }
 0x122   :  { %v260_v42 = vmax.f32 %v256_v40, 0.0  ;;  %v1813_v40 = vld [vmem:[#allocation5 + $0x1e8] sm:$0xff]  }
 0x124   :  { %v261_v43 = vpack.c.bf16 %v260_v42, %v259_v41  ;;  %v1814_v41 = vld [vmem:[#allocation5 + $0x1e0] sm:$0xff]   ;;  %v1815_v42 = vld [vmem:[#allocation5 + $0x1d8] sm:$0xff]  }
 0x126   :  { %1594 = vmatmul.mubr.bf16.vlgmr.msra.gmra.mxu1 %v261_v43 }
 0x127   :  { %1633 = vmatprep.mubr.msk.bf16.mxu1 %vm2012_vm0, %v2011_v0  ;;  %1618 = vmatpush3.bf16.msra.mxu1 %v1787_v47 }
 0x128   :  { %1619 = vmatprep.subr.bf16.mxu1 %v2011_v0 }
 0x12b   :  { %1620 = vmatpush3.bf16.msra.mxu1 %v1788_v48 }
 0x12c   :  { %1621 = vmatprep.subr.bf16.mxu1 %v2011_v0 }
 0x12f   :  { %1622 = vmatpush3.bf16.msra.mxu1 %v1789_v49 }
 0x130   :  { %1623 = vmatprep.subr.bf16.mxu1 %v2011_v0 }
 0x133   :  { %1624 = vmatpush3.bf16.msra.mxu1 %v1790_v50 }
 0x134   :  { %1625 = vmatprep.subr.bf16.mxu1 %v2011_v0 }
 0x137   :  { %1626 = vmatpush3.bf16.msra.mxu1 %v1791_v51  ;;  %v1816_v51 = vld [vmem:[#allocation5 + $0x1d0] sm:$0xff]  }
 0x138   :  { %1627 = vmatprep.subr.bf16.mxu1 %v2011_v0 }
 0x13b   :  { %1628 = vmatpush3.bf16.msra.mxu1 %v1792_v62 }
 0x13c   :  { %1629 = vmatprep.subr.bf16.mxu1 %v2011_v0 }
 0x13f   :  { %1630 = vmatpush3.bf16.msra.mxu1 %v1793_v63 }
 0x140   :  { %1631 = vmatprep.subr.bf16.mxu1 %v2011_v0 }
 0x143   :  { %1632 = vmatpush3.bf16.msra.mxu1 %v1794_v1 }
 0x144   :  { %1657 = vmatprep.subr.bf16.mxu1 %v2011_v0 }
 0x1e6   :  { %v361_v53 = vpop.f32.mrf.mxu1 }
 0x1e7   :  { %v362_v55 = vadd.f32 %v361_v53, %v278_v52  ;;  %v1818_v53 = vld [vmem:[#allocation5 + $0x1c0] sm:$0xff]  }
 0x1e8   :  { %v1595_v54 = vpop.f32.mrf.mxu1 }
 0x1e9   :  { %v368_v59 = vmax.f32 %v362_v55, 0.0  ;;  %v1819_v54 = vld [vmem:[#allocation5 + $0x238] sm:$0xff]   ;;  %v1820_v55 = vld [vmem:[#allocation5 + $0x230] sm:$0xff]  }
 0x1ea   :  { %v364_v56 = vpop.f32.mrf.mxu1 }
 0x1eb   :  { %v365_v57 = vadd.f32 %v364_v56, %v278_v52  ;;  %v1817_v52 = vld [vmem:[#allocation5 + $0x1c8] sm:$0xff]  }
 0x1ec   :  { %v1596_v58 = vpop.f32.mrf.mxu1  ;;  %v1821_v56 = vld [vmem:[#allocation5 + $0x228] sm:$0xff]  }
 0x1ed   :  { %v369_v60 = vmax.f32 %v365_v57, 0.0  ;;  %v1822_v57 = vld [vmem:[#allocation5 + $0x220] sm:$0xff]   ;;  %v1823_v58 = vld [vmem:[#allocation5 + $0x218] sm:$0xff]  }
 0x1ef   :  { %v370_v61 = vpack.c.bf16 %v369_v60, %v368_v59  ;;  %v721_v59 = vld [vmem:[#allocation8 + $0x5] ss:$0 sm:$0xff] }
 0x1f1   :  { %1614 = vmatmul.mubr.bf16.vlgmr.msra.gmra.mxu0 %v370_v61 }
 0x1f2   :  { %1653 = vmatprep.mubr.msk.bf16.mxu0 %vm2012_vm0, %v2011_v0  ;;  %1638 = vmatpush3.bf16.msra.mxu0 %v1795_v2 }
 0x1f3   :  { %1639 = vmatprep.subr.bf16.mxu0 %v2011_v0 }
 0x1f6   :  { %1640 = vmatpush3.bf16.msra.mxu0 %v1796_v3 }
 0x1f7   :  { %1641 = vmatprep.subr.bf16.mxu0 %v2011_v0 }
 0x1fa   :  { %1642 = vmatpush3.bf16.msra.mxu0 %v1797_v4 }
 0x1fb   :  { %1643 = vmatprep.subr.bf16.mxu0 %v2011_v0 }
 0x1fe   :  { %1644 = vmatpush3.bf16.msra.mxu0 %v1798_v5 }
 0x1ff   :  { %1645 = vmatprep.subr.bf16.mxu0 %v2011_v0 }
 0x202   :  { %1646 = vmatpush3.bf16.msra.mxu0 %v1799_v6  ;;  %v1824_v6 = vld [vmem:[#allocation5 + $0x210] sm:$0xff]  }
 0x203   :  { %1647 = vmatprep.subr.bf16.mxu0 %v2011_v0 }
 0x206   :  { %1648 = vmatpush3.bf16.msra.mxu0 %v1800_v17 }
 0x207   :  { %1649 = vmatprep.subr.bf16.mxu0 %v2011_v0 }
 0x20a   :  { %1650 = vmatpush3.bf16.msra.mxu0 %v1801_v18 }
 0x20b   :  { %1651 = vmatprep.subr.bf16.mxu0 %v2011_v0 }
 0x20e   :  { %1652 = vmatpush3.bf16.msra.mxu0 %v1802_v19 }
 0x20f   :  { %1677 = vmatprep.subr.bf16.mxu0 %v2011_v0 }
 0x2b1   :  { %v470_v8 = vpop.f32.mrf.mxu0 }
 0x2b2   :  { %v471_v10 = vadd.f32 %v470_v8, %v387_v7  ;;  %v1826_v8 = vld [vmem:[#allocation5 + $0x200] sm:$0xff]  }
 0x2b3   :  { %v1615_v9 = vpop.f32.mrf.mxu0 }
 0x2b4   :  { %v477_v14 = vmax.f32 %v471_v10, 0.0  ;;  %v1827_v9 = vld [vmem:[#allocation5 + $0x278] sm:$0xff]   ;;  %v1828_v10 = vld [vmem:[#allocation5 + $0x270] sm:$0xff]  }
 0x2b5   :  { %v473_v11 = vpop.f32.mrf.mxu0 }
 0x2b6   :  { %v474_v12 = vadd.f32 %v473_v11, %v387_v7  ;;  %v1825_v7 = vld [vmem:[#allocation5 + $0x208] sm:$0xff]  }
 0x2b7   :  { %v1616_v13 = vpop.f32.mrf.mxu0  ;;  %v1829_v11 = vld [vmem:[#allocation5 + $0x268] sm:$0xff]  }
 0x2b8   :  { %v478_v15 = vmax.f32 %v474_v12, 0.0  ;;  %v1830_v12 = vld [vmem:[#allocation5 + $0x260] sm:$0xff]   ;;  %v1831_v13 = vld [vmem:[#allocation5 + $0x258] sm:$0xff]  }
 0x2ba   :  { %v479_v16 = vpack.c.bf16 %v478_v15, %v477_v14  ;;  %v830_v14 = vld [vmem:[#allocation8 + $0x6] ss:$0 sm:$0xff] }
 0x2bc   :  { %1634 = vmatmul.mubr.bf16.vlgmr.msra.gmra.mxu1 %v479_v16 }
 0x2bd   :  { %1673 = vmatprep.mubr.msk.bf16.mxu1 %vm2012_vm0, %v2011_v0  ;;  %1658 = vmatpush3.bf16.msra.mxu1 %v1803_v20 }
 0x2be   :  { %1659 = vmatprep.subr.bf16.mxu1 %v2011_v0 }
 0x2c1   :  { %1660 = vmatpush3.bf16.msra.mxu1 %v1804_v21 }
 0x2c2   :  { %1661 = vmatprep.subr.bf16.mxu1 %v2011_v0 }
 0x2c5   :  { %1662 = vmatpush3.bf16.msra.mxu1 %v1805_v22 }
 0x2c6   :  { %1663 = vmatprep.subr.bf16.mxu1 %v2011_v0 }
 0x2c9   :  { %1664 = vmatpush3.bf16.msra.mxu1 %v1806_v23 }
 0x2ca   :  { %1665 = vmatprep.subr.bf16.mxu1 %v2011_v0 }
 0x2cd   :  { %1666 = vmatpush3.bf16.msra.mxu1 %v1807_v24  ;;  %v1832_v24 = vld [vmem:[#allocation5 + $0x250] sm:$0xff]  }
 0x2ce   :  { %1667 = vmatprep.subr.bf16.mxu1 %v2011_v0 }
 0x2d1   :  { %1668 = vmatpush3.bf16.msra.mxu1 %v1808_v25  ;;  %v1833_v25 = vld [vmem:[#allocation5 + $0x248] sm:$0xff]  }
 0x2d2   :  { %1669 = vmatprep.subr.bf16.mxu1 %v2011_v0 }
 0x2d5   :  { %1670 = vmatpush3.bf16.msra.mxu1 %v1809_v36  ;;  %v1852_v36 = vld [vmem:[#allocation7 + $0x24] ss:$8 sps:$4 sm:$0xff]  }
 0x2d6   :  { %1671 = vmatprep.subr.bf16.mxu1 %v2011_v0 }
 0x2d9   :  { %1672 = vmatpush3.bf16.msra.mxu1 %v1810_v37  ;;  %v1850_v37 = vld [vmem:[#allocation7 + $0x20] ss:$8 sps:$4 sm:$0xff]  }
 0x2da   :  { %1697 = vmatprep.subr.bf16.mxu1 %v2011_v0 }
 0x37c   :  { %v579_v27 = vpop.f32.mrf.mxu1 }
 0x37d   :  { %v580_v29 = vadd.f32 %v579_v27, %v496_v26  ;;  %v1835_v27 = vld [vmem:[#allocation7 + $0x70] ss:$8 sps:$4 sm:$0xff]  }
 0x37e   :  { %v1635_v28 = vpop.f32.mrf.mxu1 }
 0x37f   :  { %v586_v33 = vmax.f32 %v580_v29, 0.0  ;;  %v1837_v28 = vld [vmem:[#allocation7 + $0x74] ss:$8 sps:$4 sm:$0xff]   ;;  %v1840_v29 = vld [vmem:[#allocation7 + $0x64] ss:$8 sps:$4 sm:$0xff]  }
 0x380   :  { %v582_v30 = vpop.f32.mrf.mxu1 }
 0x381   :  { %v583_v31 = vadd.f32 %v582_v30, %v496_v26  ;;  %v1834_v26 = vld [vmem:[#allocation5 + $0x240] sm:$0xff]  }
 0x382   :  { %v1636_v32 = vpop.f32.mrf.mxu1  ;;  %v1838_v30 = vld [vmem:[#allocation7 + $0x60] ss:$8 sps:$4 sm:$0xff]  }
 0x383   :  { %v587_v34 = vmax.f32 %v583_v31, 0.0  ;;  %v1843_v31 = vld [vmem:[#allocation7 + $0x54] ss:$8 sps:$4 sm:$0xff]   ;;  %v1841_v32 = vld [vmem:[#allocation7 + $0x50] ss:$8 sps:$4 sm:$0xff]  }
 0x385   :  { %v588_v35 = vpack.c.bf16 %v587_v34, %v586_v33  ;;  %v1846_v33 = vld [vmem:[#allocation7 + $0x44] ss:$8 sps:$4 sm:$0xff]   ;;  %v1844_v34 = vld [vmem:[#allocation7 + $0x40] ss:$8 sps:$4 sm:$0xff]  }
 0x387   :  { %1654 = vmatmul.mubr.bf16.vlgmr.msra.gmra.mxu0 %v588_v35  ;;  %v1849_v35 = vld [vmem:[#allocation7 + $0x34] ss:$8 sps:$4 sm:$0xff]  }
 0x388   :  { %1693 = vmatprep.mubr.msk.bf16.mxu0 %vm2012_vm0, %v2011_v0  ;;  %1678 = vmatpush3.bf16.msra.mxu0 %v1811_v38  ;;  %v939_v38 = vld [vmem:[#allocation8 + $0x7] ss:$0 sm:$0xff] }
 0x389   :  { %1679 = vmatprep.subr.bf16.mxu0 %v2011_v0 }
 0x38c   :  { %1680 = vmatpush3.bf16.msra.mxu0 %v1812_v39 }
 0x38d   :  { %1681 = vmatprep.subr.bf16.mxu0 %v2011_v0 }
 0x390   :  { %1682 = vmatpush3.bf16.msra.mxu0 %v1813_v40 }
 0x391   :  { %1683 = vmatprep.subr.bf16.mxu0 %v2011_v0 }
 0x394   :  { %1684 = vmatpush3.bf16.msra.mxu0 %v1814_v41 }
 0x395   :  { %1685 = vmatprep.subr.bf16.mxu0 %v2011_v0 }
 0x398   :  { %1686 = vmatpush3.bf16.msra.mxu0 %v1815_v42 }
 0x399   :  { %1687 = vmatprep.subr.bf16.mxu0 %v2011_v0 }
 0x39c   :  { %1688 = vmatpush3.bf16.msra.mxu0 %v1816_v51  ;;  %v1856_v51 = vld [vmem:[#allocation7] ss:$8 sps:$4 sm:$0xff]  }
 0x39d   :  { %1689 = vmatprep.subr.bf16.mxu0 %v2011_v0 }
 0x3a0   :  { %1690 = vmatpush3.bf16.msra.mxu0 %v1817_v52  ;;  %v2013_v52 = vmov 0  }
 0x3a1   :  { %1691 = vmatprep.subr.bf16.mxu0 %v2011_v0 }
 0x3a4   :  { %1692 = vmatpush3.bf16.msra.mxu0 %v1818_v53  ;;  %v1048_v53 = vld [vmem:[#allocation8 + $0x10] ss:$0 sm:$0xff] }
 0x3a5   :  { %1717 = vmatprep.subr.bf16.mxu0 %v2011_v0 }
 0x447   :  { %v688_v43 = vpop.f32.mrf.mxu0 }
 0x448   :  { %v689_v47 = vadd.f32 %v688_v43, %v605_v44 }
 0x449   :  { %v1655_v45 = vpop.f32.mrf.mxu0 }
 0x44b   :  { %v691_v46 = vpop.f32.mrf.mxu0 }
 0x44c   :  { %v692_v48 = vadd.f32 %v691_v46, %v605_v44 }
 0x44d   :  { %v1656_v49 = vpop.f32.mrf.mxu0 }
 0x44e   :  { %v695_v50 = vpack.c.bf16 %v692_v48, %v689_v47  ;;  %v1855_v48 = vld [vmem:[#allocation7 + $0x14] ss:$8 sps:$4 sm:$0xff]   ;;  %v1853_v49 = vld [vmem:[#allocation7 + $0x10] ss:$8 sps:$4 sm:$0xff]  }
 0x450   :  { %1482 = vst [vmem:[#allocation10] sm:$0xff] %v695_v50   ;;  %1674 = vmatmul.mubr.bf16.vlgmr.msra.gmra.mxu1 %v695_v50  ;;  %v1858_v50 = vld [vmem:[#allocation7 + $0x4] ss:$8 sps:$4 sm:$0xff]  }
 0x451   :  { %1713 = vmatprep.mubr.msk.bf16.mxu1 %vm2012_vm0, %v2011_v0  ;;  %1698 = vmatpush3.bf16.msra.mxu1 %v1819_v54 }
 0x452   :  { %1699 = vmatprep.subr.bf16.mxu1 %v2011_v0 }
 0x455   :  { %1700 = vmatpush3.bf16.msra.mxu1 %v1820_v55 }
 0x456   :  { %1701 = vmatprep.subr.bf16.mxu1 %v2011_v0 }
 0x459   :  { %1702 = vmatpush3.bf16.msra.mxu1 %v1821_v56 }
 0x45a   :  { %1703 = vmatprep.subr.bf16.mxu1 %v2011_v0 }
 0x45d   :  { %1704 = vmatpush3.bf16.msra.mxu1 %v1822_v57 }
 0x45e   :  { %1705 = vmatprep.subr.bf16.mxu1 %v2011_v0 }
 0x461   :  { %1706 = vmatpush3.bf16.msra.mxu1 %v1823_v58 }
 0x462   :  { %1707 = vmatprep.subr.bf16.mxu1 %v2011_v0 }
 0x465   :  { %1708 = vmatpush3.bf16.msra.mxu1 %v1824_v6 }
 0x466   :  { %1709 = vmatprep.subr.bf16.mxu1 %v2011_v0 }
 0x469   :  { %1710 = vmatpush3.bf16.msra.mxu1 %v1825_v7 }
 0x46a   :  { %1711 = vmatprep.subr.bf16.mxu1 %v2011_v0 }
 0x46d   :  { %1712 = vmatpush3.bf16.msra.mxu1 %v1826_v8 }
 0x46e   :  { %1250 = vmatprep.subr.bf16.mxu1 %v1837_v28 }
 0x510   :  { %v804_v60 = vpop.f32.mrf.mxu1 }
 0x511   :  { %v805_v62 = vadd.f32 %v804_v60, %v721_v59 }
 0x512   :  { %v1675_v61 = vpop.f32.mrf.mxu1 }
 0x513   :  { %v811_v3 = vmax.f32 %v805_v62, 0.0 }
 0x514   :  { %v807_v63 = vpop.f32.mrf.mxu1 }
 0x515   :  { %v808_v1 = vadd.f32 %v807_v63, %v721_v59  ;;  %v1160_v63 = vlaneseq }
 0x516   :  { %v1676_v2 = vpop.f32.mrf.mxu1 }
 0x517   :  { %v812_v4 = vmax.f32 %v808_v1, 0.0  ;;  %v1161_v1 = vshrl.u32 %v1160_v63, 7 }
 0x519   :  { %v813_v5 = vpack.c.bf16 %v812_v4, %v811_v3  ;;  %v1162_v2 = vsub.s32 0, %v1161_v1  ;;  %v1166_v3 = vsub.s32 1, %v1161_v1  ;;  %v1158_v4 = vld [vmem:[#allocation8 + $0x11] ss:$8 sm:$0x3] }
 0x51b   :  { %1694 = vmatmul.mubr.bf16.vlgmr.msra.gmra.mxu0 %v813_v5  ;;  %v1163_v5 = vrot.slane %v1158_v4, %v1162_v2  ;;  %v1167_v6 = vrot.slane %v1158_v4, %v1166_v3 }
 0x51c   :  { %1733 = vmatprep.mubr.msk.bf16.mxu0 %vm2012_vm0, %v2011_v0  ;;  %1718 = vmatpush3.bf16.msra.mxu0 %v1827_v9 }
 0x51d   :  { %1719 = vmatprep.subr.bf16.mxu0 %v2011_v0 }
 0x520   :  { %1720 = vmatpush3.bf16.msra.mxu0 %v1828_v10 }
 0x521   :  { %1721 = vmatprep.subr.bf16.mxu0 %v2011_v0 }
 0x524   :  { %1722 = vmatpush3.bf16.msra.mxu0 %v1829_v11 }
 0x525   :  { %1723 = vmatprep.subr.bf16.mxu0 %v2011_v0 }
 0x528   :  { %1724 = vmatpush3.bf16.msra.mxu0 %v1830_v12 }
 0x529   :  { %1725 = vmatprep.subr.bf16.mxu0 %v2011_v0 }
 0x52c   :  { %1726 = vmatpush3.bf16.msra.mxu0 %v1831_v13 }
 0x52d   :  { %1727 = vmatprep.subr.bf16.mxu0 %v2011_v0 }
 0x530   :  { %1728 = vmatpush3.bf16.msra.mxu0 %v1832_v24 }
 0x531   :  { %1729 = vmatprep.subr.bf16.mxu0 %v2011_v0 }
 0x534   :  { %1730 = vmatpush3.bf16.msra.mxu0 %v1833_v25 }
 0x535   :  { %1731 = vmatprep.subr.bf16.mxu0 %v2011_v0  ;;  %v1847_v0 = vld [vmem:[#allocation7 + $0x30] ss:$8 sps:$4 sm:$0xff]  }
 0x538   :  { %1732 = vmatpush3.bf16.msra.mxu0 %v1834_v26 }
 0x5db   :  { %v913_v15 = vpop.f32.mrf.mxu0 }
 0x5dc   :  { %v914_v17 = vadd.f32 %v913_v15, %v830_v14 }
 0x5dd   :  { %v1695_v16 = vpop.f32.mrf.mxu0 }
 0x5de   :  { %v920_v21 = vmax.f32 %v914_v17, 0.0 }
 0x5df   :  { %v916_v18 = vpop.f32.mrf.mxu0 }
 0x5e0   :  { %v917_v19 = vadd.f32 %v916_v18, %v830_v14 }
 0x5e1   :  { %v1696_v20 = vpop.f32.mrf.mxu0 }
 0x5e2   :  { %v921_v22 = vmax.f32 %v917_v19, 0.0 }
 0x5e4   :  { %v922_v23 = vpack.c.bf16 %v921_v22, %v920_v21 }
 0x5e6   :  { %1714 = vmatmul.mubr.bf16.vlgmr.msra.gmra.mxu1 %v922_v23 }
 0x5e7   :  { %1251 = vmatpush1.bf16.msra.mxu1 %v1835_v27  ;;  %1282 = vmatprep.mubr.bf16.mxu1 %v2013_v52 }
 0x5e8   :  { %1252 = vmatprep.subr.bf16.mxu1 %v1840_v29 }
 0x5eb   :  { %1253 = vmatpush1.bf16.msra.mxu1 %v1838_v30 }
 0x5ec   :  { %1254 = vmatprep.subr.bf16.mxu1 %v1843_v31 }
 0x5ef   :  { %1255 = vmatpush1.bf16.msra.mxu1 %v1841_v32 }
 0x5f0   :  { %1256 = vmatprep.subr.bf16.mxu1 %v1846_v33 }
 0x5f3   :  { %1257 = vmatpush1.bf16.msra.mxu1 %v1844_v34 }
 0x5f4   :  { %1258 = vmatprep.subr.bf16.mxu1 %v1849_v35 }
 0x5f7   :  { %1259 = vmatpush1.bf16.msra.mxu1 %v1847_v0 }
 0x5f8   :  { %1260 = vmatprep.subr.bf16.mxu1 %v1852_v36 }
 0x5fb   :  { %1261 = vmatpush1.bf16.msra.mxu1 %v1850_v37 }
 0x5fc   :  { %1262 = vmatprep.subr.bf16.mxu1 %v1855_v48 }
 0x5ff   :  { %1263 = vmatpush1.bf16.msra.mxu1 %v1853_v49 }
 0x600   :  { %1264 = vmatprep.subr.bf16.mxu1 %v1858_v50 }
 0x603   :  { %1265 = vmatpush1.bf16.msra.mxu1 %v1856_v51 }
 0x6a6   :  { %v1022_v39 = vpop.f32.mrf.mxu1 }
 0x6a7   :  { %v1023_v41 = vadd.f32 %v1022_v39, %v939_v38 }
 0x6a8   :  { %v1715_v40 = vpop.f32.mrf.mxu1 }
 0x6a9   :  { %v1029_v45 = vmax.f32 %v1023_v41, 0.0 }
 0x6aa   :  { %v1025_v42 = vpop.f32.mrf.mxu1 }
 0x6ab   :  { %v1026_v43 = vadd.f32 %v1025_v42, %v939_v38 }
 0x6ac   :  { %v1716_v44 = vpop.f32.mrf.mxu1 }
 0x6ad   :  { %v1030_v46 = vmax.f32 %v1026_v43, 0.0 }
 0x6af   :  { %v1031_v47 = vpack.c.bf16 %v1030_v46, %v1029_v45 }
 0x6b1   :  { %1734 = vmatmul.mubr.bf16.vlgmr.msra.gmra.mxu0 %v1031_v47 }
 0x771   :  { %v1131_v54 = vpop.f32.mrf.mxu0 }
 0x772   :  { %v1132_v56 = vadd.f32 %v1131_v54, %v1048_v53 }
 0x773   :  { %v1735_v55 = vpop.f32.mrf.mxu0 }
 0x774   :  { %v1138_v60 = vmax.f32 %v1132_v56, 0.0 }
 0x775   :  { %v1134_v57 = vpop.f32.mrf.mxu0 }
 0x776   :  { %v1135_v58 = vadd.f32 %v1134_v57, %v1048_v53 }
 0x777   :  { %v1736_v59 = vpop.f32.mrf.mxu0 }
 0x778   :  { %v1139_v61 = vmax.f32 %v1135_v58, 0.0 }
 0x77a   :  { %v1140_v62 = vpack.c.bf16 %v1139_v61, %v1138_v60 }
 0x77c   :  { %1283 = vmatmul.mubr.bf16.vlgmr.msra.gmra.mxu1 %v1140_v62 }
 0x83c   :  { %v1284_v7 = vpop.f32.mrf.mxu1 }
 0x83d   :  { %v1285_v9 = vadd.f32 %v1284_v7, %v1163_v5 }
 0x83e   :  { %v1286_v8 = vpop.f32.mrf.mxu1 }
 0x83f   :  { %v1287_v10 = vadd.f32 %v1286_v8, %v1167_v6 }
 0x840   :  { %v1288_v11 = vpop.f32.mrf.mxu1 }
 0x841   :  { %v1293_v12 = vmax.f32 %v1285_v9, %v1287_v10  ;;  %v1289_v14 = vadd.f32 %v1288_v11, %v1163_v5 }
 0x842   :  { %v1290_v13 = vpop.f32.mrf.mxu1 }
 0x843   :  { %v1291_v15 = vadd.f32 %v1290_v13, %v1167_v6  ;;  %1294 = vmax.xlane.f32.xlu0 %v1293_v12 }
 0x845   :  { %v1296_v16 = vmax.f32 %v1289_v14, %v1291_v15 }
 0x847   :  { %1297 = vmax.xlane.f32.xlu0 %v1296_v16 }
 0x8cc   :  { %v1295_v17 = vpop.xlane.xlu0 %1294 }
 0x8cd   :  { %v1299_v18 = vsub.f32 %v1285_v9, %v1295_v17  ;;  %v1300_v19 = vsub.f32 %v1287_v10, %v1295_v17 }
 0x8cf   :  { %v1303_v20 = vmul.f32 1.442695, %v1299_v18  ;;  %v1305_v21 = vmul.f32 1.442695, %v1300_v19 }
 0x8d0   :  { %v1298_v22 = vpop.xlane.xlu0 %1297 }
 0x8d1   :  { %1859 = vpow2.f32 %v1303_v20  ;;  %v1301_v23 = vsub.f32 %v1289_v14, %v1298_v22  ;;  %v1302_v24 = vsub.f32 %v1291_v15, %v1298_v22 }
 0x8d2   :  { %1861 = vpow2.f32 %v1305_v21 }
 0x8d3   :  { %v1307_v25 = vmul.f32 1.442695, %v1301_v23  ;;  %v1309_v26 = vmul.f32 1.442695, %v1302_v24 }
 0x8d5   :  { %1863 = vpow2.f32 %v1307_v25 }
 0x8d6   :  { %1865 = vpow2.f32 %v1309_v26 }
 0x8de   :  { %v1860_v27 = vpop.eup %1859 }
 0x8df   :  { %v1862_v28 = vpop.eup %1861 }
 0x8e0   :  { %v1311_v29 = vadd.f32 %v1862_v28, %v1860_v27 }
 0x8e2   :  { %v1864_v30 = vpop.eup %1863  ;;  %1312 = vadd.xlane.f32.xlu1 %v1311_v29 }
 0x8e3   :  { %v1866_v31 = vpop.eup %1865 }
 0x8e4   :  { %v1314_v32 = vadd.f32 %v1866_v31, %v1864_v30 }
 0x8e6   :  { %1315 = vadd.xlane.f32.xlu1 %v1314_v32 }
 0x8e7   :  { %1962 = shalt.err (!%p1959_p10)
}
 0x8e8   :  { %1348 = dma.vmem_to_hbm [thread:$0]  %s1343_s3, 128, %s2163_s4, [#allocation4], %s2002_s21, %s2002_s21, %s2003_s22  }
 0x8e9   :  { %s2015_s20 = smov [#allocation11]  }
 0x8ea   :  { %s1354_s23 = sshll.u32 %s2015_s20, 4  ;;  %s1355_s23 = int_to_ptr.vmem [resolvable:$true] %s1354_s23 }
 0x8eb   :  { %s1971_s24 = scalar_lea.vmem %s1355_s23, 256  ;;  %p1976_p12 = scmp.lt.s32.totalorder %s1355_s23, %s1355_s23 }
 0x8ec   :  { %p1972_p11 = scmp.ne.s32.totalorder %s1355_s23, %s1971_s24  ;;  %p1977_p13 = scmp.lt.s32.totalorder %s1971_s24, %s1971_s24 }
 0x8ee   :  { %p1978_p0 = por %p1977_p13, %p1976_p12 }
 0x8f0   :  { %p1979_p1 = pnand %p1978_p0, %p1972_p11 }
 0x96b   :  { %v1313_v33 = vpop.xlane.xlu1 %1312 }
 0x96c   :  { %1867 = vrcp.f32 %v1313_v33 }
 0x96f   :  { %v1316_v34 = vpop.xlane.xlu1 %1315 }
 0x970   :  { %1869 = vrcp.f32 %v1316_v34 }
 0x979   :  { %v1868_v35 = vpop.eup %1867 }
 0x97a   :  { %v1319_v0 = vmul.f32 %v1868_v35, %v1860_v27  ;;  %v1320_v36 = vmul.f32 %v1868_v35, %v1862_v28 }
 0x97c   :  { %v1476_v37 = vpack.c.bf16 %v1320_v36, %v1319_v0 }
 0x97d   :  { %v1870_v38 = vpop.eup %1869 }
 0x97e   :  { %v1321_v39 = vmul.f32 %v1870_v38, %v1864_v30  ;;  %v1322_v40 = vmul.f32 %v1870_v38, %v1866_v31  ;;  %1335 = vst [vmem:[#allocation11] sm:$0xff] %v1476_v37 }
 0x980   :  { %v1477_v41 = vpack.c.bf16 %v1322_v40, %v1321_v39 }
 0x982   :  { %1336 = vst [vmem:[#allocation11 + $0x8] sm:$0xff] %v1477_v41 }
 0x983   :  { %1982 = shalt.err (!%p1979_p1)
}
 0x984   :  { %1360 = dma.vmem_to_hbm [thread:$0]  %s1355_s23, 256, %s2164_s5, [#allocation12], %s2005_s28, %s2005_s28, %s2006_s29  }
 0x985   :  { %1997 = dma.done.wait [#allocation4], 128  }
 0x986   :  { %1998 = vsyncadd [#allocation4], 4294967168 }
 0x987   :  { %1999 = dma.done.wait [#allocation12], 256  }
 0x988   :  { %2000 = vsyncadd [#allocation12], 4294967040 }
 0x989   :  { %1367 = vsyncpa [#allocation3], 1 }
 0x98a   :  { %1368 = vsyncpa [#allocation6], 1 }
 0x98b   :  { %1369 = vsyncpa [#allocation9], 1 }
 0x98c   :  { %1370 = vsyncpa [#allocation4], 1 }
 0x98d   :  { %1371 = vsyncpa [#allocation12], 1 }

</bundles_post_ra>
